<compile_context>
chip_gen: v7x
topology: tpu7x:2x2x1
jax: 0.10.0
libtpu: 0.0.40
codegen_flags: <defaults>
</compile_context>

<pallas_src>
import math

import jax
import jax.numpy as jnp
from jax.experimental import pallas as pl
from jax.experimental.pallas import tpu as pltpu

IMG_DIM = 28 * 28 * 1  # 784
LEAKY_SLOPE = 0.1      # matches nn.LeakyReLU(0.1)


def _round_up(n, m):
    return ((n + m - 1) // m) * m


def _leaky_relu(x, slope=LEAKY_SLOPE):
    return jnp.where(x > 0, x, slope * x)


def discriminator_kernel(x_ref,
                         w1_ref, b1_ref,
                         w2_ref, b2_ref,
                         w3_ref, b3_ref,
                         w4_ref, b4_ref,
                         o_ref):
    # x_ref: (bt, 784), batch on sublanes. Cast to bf16 in-kernel (no wrapper copy).
    x = x_ref[...].astype(jnp.bfloat16)

    # Layer 1: (bt,784)@(784,128) -> f32 (bt,128)
    h = jnp.dot(x, w1_ref[...], preferred_element_type=jnp.float32) + b1_ref[...]
    h = _leaky_relu(h).astype(jnp.bfloat16)

    # Layer 2: (bt,128)@(128,64)
    h = jnp.dot(h, w2_ref[...], preferred_element_type=jnp.float32) + b2_ref[...]
    h = _leaky_relu(h).astype(jnp.bfloat16)

    # Layer 3: (bt,64)@(64,32)
    h = jnp.dot(h, w3_ref[...], preferred_element_type=jnp.float32) + b3_ref[...]
    h = _leaky_relu(h).astype(jnp.bfloat16)

    # Layer 4: (bt,32)@(32,1) -> sigmoid.  (bt,1) store is ~4 B/sample -> noise.
    z = jnp.dot(h, w4_ref[...], preferred_element_type=jnp.float32) + b4_ref[...]
    o_ref[...] = jax.nn.sigmoid(z).astype(o_ref.dtype)


def discriminator_forward(x, params, *, batch_tile=2048):
    """x: (B, IMG_DIM) float32 (or bfloat16). Returns (B, 1) float32 sigmoid output."""
    B, D = x.shape
    assert D == IMG_DIM
    batch_tile = max(8, _round_up(batch_tile, 8))

    # Batch is on the sublane axis -> only 8-alignment needed.  Clamp for small
    # batches and aim for >= 2 tiles so both v7x TensorCores are used.
    bt = min(batch_tile, max(8, _round_up(pl.cdiv(B, 2), 8)))
    num_tiles = pl.cdiv(B, bt)
    # NOTE: no jnp.pad of x -- the boundary tile is a masked partial block; its
    # garbage rows only affect output rows beyond B, which the store drops.

    # Tiny one-time weight prep: (out,in) -> (in,out) bf16; biases (1,out) f32.
    (w1, b1), (w2, b2), (w3, b3), (w4, b4) = [
        (w.T.astype(jnp.bfloat16), b.reshape(1, -1).astype(jnp.float32))
        for (w, b) in params
    ]

    def resident_spec(arr):
        # Grid-invariant operand: whole array, constant index_map -> stays resident.
        return pl.BlockSpec(arr.shape, lambda i: (0,) * arr.ndim)

    def run(x_spec):
        return pl.pallas_call(
            discriminator_kernel,
            out_shape=jax.ShapeDtypeStruct((B, 1), jnp.float32),
            grid_spec=pltpu.PrefetchScalarGridSpec(
                num_scalar_prefetch=0,
                grid=(num_tiles,),
                in_specs=[
                    x_spec,
                    resident_spec(w1), resident_spec(b1),
                    resident_spec(w2), resident_spec(b2),
                    resident_spec(w3), resident_spec(b3),
                    resident_spec(w4), resident_spec(b4),
                ],
                out_specs=pl.BlockSpec((bt, 1), lambda i: (i, 0)),
            ),
            compiler_params=pltpu.CompilerParams(
                dimension_semantics=("parallel",),   # batch tiles shard across TCs (v7x)
                vmem_limit_bytes=48 * 1024 * 1024,   # headroom for bt=2048 f32 tiles
            ),
        )(x, w1, b1, w2, b2, w3, b3, w4, b4)

    # x is the only large per-step DMA: ask for a third buffer to hide step jitter,
    # fall back to default double-buffering if this JAX build rejects it.
    try:
        out = run(pl.BlockSpec((bt, D), lambda i: (i, 0), pipeline_mode=pl.Buffered(3)))
    except Exception:
        out = run(pl.BlockSpec((bt, D), lambda i: (i, 0)))
    return out


def init_params(key):
    """nn.Linear-style init, PyTorch layout: weight (out_features, in_features), bias (out_features,)."""
    dims = [(IMG_DIM, 128), (128, 64), (64, 32), (32, 1)]
    params = []
    for fan_in, fan_out in dims:
        key, kw, kb = jax.random.split(key, 3)
        bound = 1.0 / math.sqrt(fan_in)
        w = jax.random.uniform(kw, (fan_out, fan_in), jnp.float32, -bound, bound)
        b = jax.random.uniform(kb, (fan_out,), jnp.float32, -bound, bound)
        params.append((w, b))
    return params


def reference_forward(x, params):
    """Pure-JAX f32 reference matching the PyTorch module semantics."""
    h = x
    n = len(params)
    for i, (w, b) in enumerate(params):
        h = h @ w.T + b.reshape(1, -1)
        if i < n - 1:
            h = jnp.where(h > 0, h, LEAKY_SLOPE * h)
    return jax.nn.sigmoid(h)


if __name__ == "__main__":
    key = jax.random.PRNGKey(0)
    kx, kx2, kp = jax.random.split(key, 3)
    params = init_params(kp)

    # Small demo batch (single grid step, partial tile).
    B = 8
    x = jax.random.normal(kx, (B, IMG_DIM), jnp.float32)
    out = jax.block_until_ready(discriminator_forward(x, params))
    ref = reference_forward(x, params)
    assert out.shape == (B, 1), out.shape
    # bf16 x/weight quantization inside the kernel is intentional -> loose tolerance.
    assert jnp.allclose(out, ref, atol=3e-2), "mismatch vs reference (B=8)"

    # Non-divisible batch spanning two grid steps (exercises the masked boundary block).
    B2 = 300
    x2 = jax.random.normal(kx2, (B2, IMG_DIM), jnp.float32)
    out2 = jax.block_until_ready(discriminator_forward(x2, params))
    ref2 = reference_forward(x2, params)
    assert out2.shape == (B2, 1), out2.shape
    assert jnp.allclose(out2, ref2, atol=3e-2), "mismatch vs reference (B=300)"

    print("KERNEL_OK")
</pallas_src>

<mosaic_0001>
module attributes {stable_mosaic.version = 11 : i64} {
  func.func @discriminator_kernel(%arg0: i32, %arg1: memref<8x784xf32, #tpu.memory_space<vmem>>, %arg2: memref<784x128xbf16, #tpu.memory_space<vmem>>, %arg3: memref<1x128xf32, #tpu.memory_space<vmem>>, %arg4: memref<128x64xbf16, #tpu.memory_space<vmem>>, %arg5: memref<1x64xf32, #tpu.memory_space<vmem>>, %arg6: memref<64x32xbf16, #tpu.memory_space<vmem>>, %arg7: memref<1x32xf32, #tpu.memory_space<vmem>>, %arg8: memref<32x1xbf16, #tpu.memory_space<vmem>>, %arg9: memref<1x1xf32, #tpu.memory_space<vmem>>, %arg10: memref<8x1xf32, #tpu.memory_space<vmem>>) attributes {dimension_semantics = [#tpu.dimension_semantics<parallel>], iteration_bounds = array<i64: 1>, scalar_prefetch = 0 : i64, scratch_operands = 0 : i64, tpu.core_type = #tpu.core_type<tc>, window_params = [{transform_indices = @transform_0, window_bounds = array<i64: 8, 784>}, {pipeline_mode = #tpu.pipeline_mode<synchronous>, transform_indices = @transform_1, window_bounds = array<i64: 784, 128>}, {pipeline_mode = #tpu.pipeline_mode<synchronous>, transform_indices = @transform_2, window_bounds = array<i64: 1, 128>}, {pipeline_mode = #tpu.pipeline_mode<synchronous>, transform_indices = @transform_3, window_bounds = array<i64: 128, 64>}, {pipeline_mode = #tpu.pipeline_mode<synchronous>, transform_indices = @transform_4, window_bounds = array<i64: 1, 64>}, {pipeline_mode = #tpu.pipeline_mode<synchronous>, transform_indices = @transform_5, window_bounds = array<i64: 64, 32>}, {pipeline_mode = #tpu.pipeline_mode<synchronous>, transform_indices = @transform_6, window_bounds = array<i64: 1, 32>}, {pipeline_mode = #tpu.pipeline_mode<synchronous>, transform_indices = @transform_7, window_bounds = array<i64: 32, 1>}, {pipeline_mode = #tpu.pipeline_mode<synchronous>, transform_indices = @transform_8, window_bounds = array<i64: 1, 1>}, {transform_indices = @transform_9, window_bounds = array<i64: 8, 1>}]} {
    %c0 = arith.constant 0 : index
    %c0_0 = arith.constant 0 : index
    %0 = vector.load %arg1[%c0, %c0_0] : memref<8x784xf32, #tpu.memory_space<vmem>>, vector<8x784xf32>
    %1 = arith.truncf %0 : vector<8x784xf32> to vector<8x784xbf16>
    %c0_1 = arith.constant 0 : index
    %c0_2 = arith.constant 0 : index
    %2 = vector.load %arg2[%c0_1, %c0_2] : memref<784x128xbf16, #tpu.memory_space<vmem>>, vector<784x128xbf16>
    %cst = arith.constant dense<0.000000e+00> : vector<8x128xf32>
    %3 = tpu.matmul %1, %2, %cst {dimension_numbers = #tpu.dot_dimension_numbers<[1], [0], [0], [1], [0, 0, 1, 1], [], []>} : vector<8x784xbf16>, vector<784x128xbf16>, vector<8x128xf32> -> vector<8x128xf32>
    %c0_3 = arith.constant 0 : index
    %c0_4 = arith.constant 0 : index
    %4 = vector.load %arg3[%c0_3, %c0_4] : memref<1x128xf32, #tpu.memory_space<vmem>>, vector<1x128xf32>
    %5 = vector.broadcast %4 : vector<1x128xf32> to vector<8x128xf32>
    %6 = arith.addf %3, %5 : vector<8x128xf32>
    %cst_5 = arith.constant 0.000000e+00 : f32
    %7 = vector.broadcast %cst_5 : f32 to vector<8x128xf32>
    %8 = arith.cmpf ogt, %6, %7 : vector<8x128xf32>
    %cst_6 = arith.constant 1.000000e-01 : f32
    %9 = vector.broadcast %cst_6 : f32 to vector<8x128xf32>
    %10 = arith.mulf %9, %6 : vector<8x128xf32>
    %11 = arith.select %8, %6, %10 : vector<8x128xi1>, vector<8x128xf32>
    %12 = arith.truncf %11 : vector<8x128xf32> to vector<8x128xbf16>
    %c0_7 = arith.constant 0 : index
    %c0_8 = arith.constant 0 : index
    %13 = vector.load %arg4[%c0_7, %c0_8] : memref<128x64xbf16, #tpu.memory_space<vmem>>, vector<128x64xbf16>
    %cst_9 = arith.constant dense<0.000000e+00> : vector<8x64xf32>
    %14 = tpu.matmul %12, %13, %cst_9 {dimension_numbers = #tpu.dot_dimension_numbers<[1], [0], [0], [1], [0, 0, 1, 1], [], []>} : vector<8x128xbf16>, vector<128x64xbf16>, vector<8x64xf32> -> vector<8x64xf32>
    %c0_10 = arith.constant 0 : index
    %c0_11 = arith.constant 0 : index
    %15 = vector.load %arg5[%c0_10, %c0_11] : memref<1x64xf32, #tpu.memory_space<vmem>>, vector<1x64xf32>
    %16 = vector.broadcast %15 : vector<1x64xf32> to vector<8x64xf32>
    %17 = arith.addf %14, %16 : vector<8x64xf32>
    %cst_12 = arith.constant 0.000000e+00 : f32
    %18 = vector.broadcast %cst_12 : f32 to vector<8x64xf32>
    %19 = arith.cmpf ogt, %17, %18 : vector<8x64xf32>
    %cst_13 = arith.constant 1.000000e-01 : f32
    %20 = vector.broadcast %cst_13 : f32 to vector<8x64xf32>
    %21 = arith.mulf %20, %17 : vector<8x64xf32>
    %22 = arith.select %19, %17, %21 : vector<8x64xi1>, vector<8x64xf32>
    %23 = arith.truncf %22 : vector<8x64xf32> to vector<8x64xbf16>
    %c0_14 = arith.constant 0 : index
    %c0_15 = arith.constant 0 : index
    %24 = vector.load %arg6[%c0_14, %c0_15] : memref<64x32xbf16, #tpu.memory_space<vmem>>, vector<64x32xbf16>
    %cst_16 = arith.constant dense<0.000000e+00> : vector<8x32xf32>
    %25 = tpu.matmul %23, %24, %cst_16 {dimension_numbers = #tpu.dot_dimension_numbers<[1], [0], [0], [1], [0, 0, 1, 1], [], []>} : vector<8x64xbf16>, vector<64x32xbf16>, vector<8x32xf32> -> vector<8x32xf32>
    %c0_17 = arith.constant 0 : index
    %c0_18 = arith.constant 0 : index
    %26 = vector.load %arg7[%c0_17, %c0_18] : memref<1x32xf32, #tpu.memory_space<vmem>>, vector<1x32xf32>
    %27 = vector.broadcast %26 : vector<1x32xf32> to vector<8x32xf32>
    %28 = arith.addf %25, %27 : vector<8x32xf32>
    %cst_19 = arith.constant 0.000000e+00 : f32
    %29 = vector.broadcast %cst_19 : f32 to vector<8x32xf32>
    %30 = arith.cmpf ogt, %28, %29 : vector<8x32xf32>
    %cst_20 = arith.constant 1.000000e-01 : f32
    %31 = vector.broadcast %cst_20 : f32 to vector<8x32xf32>
    %32 = arith.mulf %31, %28 : vector<8x32xf32>
    %33 = arith.select %30, %28, %32 : vector<8x32xi1>, vector<8x32xf32>
    %34 = arith.truncf %33 : vector<8x32xf32> to vector<8x32xbf16>
    %c0_21 = arith.constant 0 : index
    %c0_22 = arith.constant 0 : index
    %35 = vector.load %arg8[%c0_21, %c0_22] : memref<32x1xbf16, #tpu.memory_space<vmem>>, vector<32x1xbf16>
    %cst_23 = arith.constant dense<0.000000e+00> : vector<8x1xf32>
    %36 = tpu.matmul %34, %35, %cst_23 {dimension_numbers = #tpu.dot_dimension_numbers<[1], [0], [0], [1], [0, 0, 1, 1], [], []>} : vector<8x32xbf16>, vector<32x1xbf16>, vector<8x1xf32> -> vector<8x1xf32>
    %c0_24 = arith.constant 0 : index
    %c0_25 = arith.constant 0 : index
    %37 = vector.load %arg9[%c0_24, %c0_25] : memref<1x1xf32, #tpu.memory_space<vmem>>, vector<1x1xf32>
    %38 = vector.broadcast %37 : vector<1x1xf32> to vector<8x1xf32>
    %39 = arith.addf %36, %38 : vector<8x1xf32>
    %40 = arith.negf %39 : vector<8x1xf32>
    %41 = math.exp %40 : vector<8x1xf32>
    %cst_26 = arith.constant 1.000000e+00 : f32
    %42 = vector.broadcast %cst_26 : f32 to vector<8x1xf32>
    %43 = arith.addf %42, %41 : vector<8x1xf32>
    %44 = arith.divf %42, %43 : vector<8x1xf32>
    %c0_27 = arith.constant 0 : index
    %c0_28 = arith.constant 0 : index
    %45 = vector.load %arg10[%c0_27, %c0_28] : memref<8x1xf32, #tpu.memory_space<vmem>>, vector<8x1xf32>
    tpu.vector_store %arg10[%c0_27, %c0_28], %44 {strides = array<i32>} : memref<8x1xf32, #tpu.memory_space<vmem>>, vector<8x1xf32>,
    return
  }
  func.func @transform_0(%arg0: i32) -> (i32, i32) {
    %c0_i32 = arith.constant 0 : i32
    %c0_i32_0 = arith.constant 0 : i32
    return %arg0, %c0_i32 : i32, i32
  }
  func.func @transform_1(%arg0: i32) -> (i32, i32) {
    %c0_i32 = arith.constant 0 : i32
    %c0_i32_0 = arith.constant 0 : i32
    %c0_i32_1 = arith.constant 0 : i32
    return %c0_i32, %c0_i32_0 : i32, i32
  }
  func.func @transform_2(%arg0: i32) -> (i32, i32) {
    %c0_i32 = arith.constant 0 : i32
    %c0_i32_0 = arith.constant 0 : i32
    %c0_i32_1 = arith.constant 0 : i32
    return %c0_i32, %c0_i32_0 : i32, i32
  }
  func.func @transform_3(%arg0: i32) -> (i32, i32) {
    %c0_i32 = arith.constant 0 : i32
    %c0_i32_0 = arith.constant 0 : i32
    %c0_i32_1 = arith.constant 0 : i32
    return %c0_i32, %c0_i32_0 : i32, i32
  }
  func.func @transform_4(%arg0: i32) -> (i32, i32) {
    %c0_i32 = arith.constant 0 : i32
    %c0_i32_0 = arith.constant 0 : i32
    %c0_i32_1 = arith.constant 0 : i32
    return %c0_i32, %c0_i32_0 : i32, i32
  }
  func.func @transform_5(%arg0: i32) -> (i32, i32) {
    %c0_i32 = arith.constant 0 : i32
    %c0_i32_0 = arith.constant 0 : i32
    %c0_i32_1 = arith.constant 0 : i32
    return %c0_i32, %c0_i32_0 : i32, i32
  }
  func.func @transform_6(%arg0: i32) -> (i32, i32) {
    %c0_i32 = arith.constant 0 : i32
    %c0_i32_0 = arith.constant 0 : i32
    %c0_i32_1 = arith.constant 0 : i32
    return %c0_i32, %c0_i32_0 : i32, i32
  }
  func.func @transform_7(%arg0: i32) -> (i32, i32) {
    %c0_i32 = arith.constant 0 : i32
    %c0_i32_0 = arith.constant 0 : i32
    %c0_i32_1 = arith.constant 0 : i32
    return %c0_i32, %c0_i32_0 : i32, i32
  }
  func.func @transform_8(%arg0: i32) -> (i32, i32) {
    %c0_i32 = arith.constant 0 : i32
    %c0_i32_0 = arith.constant 0 : i32
    %c0_i32_1 = arith.constant 0 : i32
    return %c0_i32, %c0_i32_0 : i32, i32
  }
  func.func @transform_9(%arg0: i32) -> (i32, i32) {
    %c0_i32 = arith.constant 0 : i32
    %c0_i32_0 = arith.constant 0 : i32
    return %arg0, %c0_i32 : i32, i32
  }
}

</mosaic_0001>

<bundles_post_ra>
// kernel: tpu_custom_call.1
= control target key start
LH: loop header
LB: loop body
LE: loop exit
PB: predicated region body
PF: predicated region fallthrough
CT: control target
= control target key end

     0   :  { %s1378_s0 = inlined_call_operand.vmem [shape: f32[8,784], index: 0, kind: input, shape index: {}]   ;;  %s1379_s1 = inlined_call_operand.hbm [shape: bf16[784,128], index: 1, kind: input, shape index: {}]   ;;  %s1380_s2 = inlined_call_operand.vmem [shape: f32[1,128], index: 2, kind: input, shape index: {}]   ;;  %s1381_s3 = inlined_call_operand.vmem [shape: bf16[128,64], index: 3, kind: input, shape index: {}]   ;;  %s1382_s4 = inlined_call_operand.vmem [shape: f32[1,64], index: 4, kind: input, shape index: {}]   ;;  %s1383_s5 = inlined_call_operand.vmem [shape: bf16[64,32], index: 5, kind: input, shape index: {}]   ;;  %s1384_s6 = inlined_call_operand.vmem [shape: f32[1,32], index: 6, kind: input, shape index: {}]   ;;  %s1385_s7 = inlined_call_operand.vmem [shape: bf16[32,1], index: 7, kind: input, shape index: {}]   ;;  %s1386_s8 = inlined_call_operand.<no memory space> [shape: f32[1,1], index: 8, kind: input, shape index: {}]   ;;  %s1387_s9 = inlined_call_operand.vmem [shape: f32[8,1], index: 9, kind: output, shape index: {}]  }
   0x1   :  { %v14_v0 = vstv %s1386_s8 }
   0x2   :  { %15 = vst [vmem:[#allocation2] sm:$0x1] %v14_v0 }
   0x3   :  { %16 = vsyncpa [#allocation4], 0  ;;  %s1210_s11 = smov [#allocation3]   ;;  %s1186_s15 = scalar_lea.hbm %s1379_s1, 6272 }
   0x4   :  { %s24_s12 = sshll.u32 %s1210_s11, 4  ;;  %p1187_p0 = scmp.ne.s32.totalorder %s1379_s1, %s1186_s15  ;;  %s25_s12 = int_to_ptr.vmem [resolvable:$true] %s24_s12 }
   0x5   :  { %p1190_p1 = scmp.lt.u32.totalorder %s1186_s15, %s1379_s1 }
   0x7   :  { %p1192_p2 = pnand %p1190_p1, %p1187_p0 }
   0x9   :  { %1195 = shalt.err (!%p1192_p2)
}
   0xa   :  { %s1196_s8 = scalar_lea.vmem %s25_s12, 6272  ;;  %p1201_p4 = scmp.lt.s32.totalorder %s25_s12, %s25_s12 }
   0xb   :  { %p1197_p3 = scmp.ne.s32.totalorder %s25_s12, %s1196_s8  ;;  %p1202_p5 = scmp.lt.s32.totalorder %s1196_s8, %s1196_s8 }
   0xd   :  { %p1203_p6 = por %p1202_p5, %p1201_p4 }
   0xf   :  { %p1204_p7 = pnand %p1203_p6, %p1197_p3 }
  0x11   :  { %1207 = shalt.err (!%p1204_p7)
}
  0x12   :  { %s1211_s20 = smov 64   ;;  %s1212_s21 = smov 4  }
  0x13   :  { %30 = dma.hbm_to_vmem [thread:$0]  %s1379_s1, 6272, %s25_s12, [#allocation4], %s1211_s20, %s1211_s20, %s1212_s21  }
  0x14   :  { %1208 = dma.done.wait [#allocation4], 6272  }
  0x15   :  { %1209 = vsyncadd [#allocation4], 4294961024  ;;  %v1119_v1 = vld [vmem:[#allocation3 + $0x40] sm:$0xff]   ;;  %v1123_v5 = vld [vmem:[#allocation3 + $0x48] sm:$0xff]   ;;  %v1213_v45 = vmov 0.0   ;;  %vm1214_vm0 = vmmov 0  }
  0x16   :  { %v1120_v2 = vld [vmem:[#allocation3] sm:$0xff]   ;;  %983 = vmatprep.subr.bf16.mxu0 %v1119_v1  ;;  %v1124_v6 = vld [vmem:[#allocation3 + $0x8] sm:$0xff]   ;;  %v1127_v9 = vld [vmem:[#allocation3 + $0x50] sm:$0xff]   ;;  %vm462_vm1 = vcmask 130048   ;;  %vm784_vm4 = vcmask 523264   ;;  %vm855_vm6 = vcmask 261120  }
  0x17   :  { %v1121_v3 = vld [vmem:[#allocation3 + $0xc0] sm:$0xff]   ;;  %984 = vmatpush3.bf16.msra.mxu0 %v1120_v2  ;;  %v1125_v7 = vld [vmem:[#allocation3 + $0xc8] sm:$0xff]   ;;  %v1128_v10 = vld [vmem:[#allocation3 + $0x10] sm:$0xff]   ;;  %vm905_vm7 = vcmask 7168  }
  0x18   :  { %v1122_v4 = vld [vmem:[#allocation3 + $0x80] sm:$0xff]   ;;  %1005 = vmatprep.subr.bf16.mxu1 %v1121_v3  ;;  %985 = vmatprep.subr.bf16.mxu0 %v1123_v5  ;;  %v1126_v8 = vld [vmem:[#allocation3 + $0x88] sm:$0xff]   ;;  %v1129_v11 = vld [vmem:[#allocation3 + $0xd0] sm:$0xff]  }
  0x19   :  { %1006 = vmatpush3.bf16.msra.mxu1 %v1122_v4  ;;  %v1130_v12 = vld [vmem:[#allocation3 + $0x90] sm:$0xff]   ;;  %v1131_v13 = vld [vmem:[#allocation3 + $0x58] sm:$0xff]   ;;  %v1135_v17 = vld [vmem:[#allocation3 + $0x60] sm:$0xff]  }
  0x1a   :  { %1007 = vmatprep.subr.bf16.mxu1 %v1125_v7  ;;  %v1132_v14 = vld [vmem:[#allocation3 + $0x18] sm:$0xff]   ;;  %v1136_v18 = vld [vmem:[#allocation3 + $0x20] sm:$0xff]   ;;  %v1139_v21 = vld [vmem:[#allocation3 + $0x68] sm:$0xff]  }
  0x1b   :  { %986 = vmatpush3.bf16.msra.mxu0 %v1124_v6  ;;  %v1133_v15 = vld [vmem:[#allocation3 + $0xd8] sm:$0xff]   ;;  %v1137_v19 = vld [vmem:[#allocation3 + $0xe0] sm:$0xff]   ;;  %v1140_v22 = vld [vmem:[#allocation3 + $0x28] sm:$0xff]  }
  0x1c   :  { %987 = vmatprep.subr.bf16.mxu0 %v1127_v9  ;;  %v1134_v16 = vld [vmem:[#allocation3 + $0x98] sm:$0xff]   ;;  %v1138_v20 = vld [vmem:[#allocation3 + $0xa0] sm:$0xff]   ;;  %v1141_v23 = vld [vmem:[#allocation3 + $0xe8] sm:$0xff]  }
  0x1d   :  { %1008 = vmatpush3.bf16.msra.mxu1 %v1126_v8  ;;  %v1142_v24 = vld [vmem:[#allocation3 + $0xa8] sm:$0xff]   ;;  %v1143_v25 = vld [vmem:[#allocation3 + $0x70] sm:$0xff]   ;;  %v1147_v29 = vld [vmem:[#allocation3 + $0x78] sm:$0xff]  }
  0x1e   :  { %1009 = vmatprep.subr.bf16.mxu1 %v1129_v11  ;;  %v1144_v26 = vld [vmem:[#allocation3 + $0x30] sm:$0xff]   ;;  %v1148_v30 = vld [vmem:[#allocation3 + $0x38] sm:$0xff]   ;;  %v50_v32 = vld [vmem:[%s1378_s0 + $0x8] sm:$0xff] }
  0x1f   :  { %988 = vmatpush3.bf16.msra.mxu0 %v1128_v10  ;;  %v1145_v27 = vld [vmem:[#allocation3 + $0xf0] sm:$0xff]   ;;  %v1149_v31 = vld [vmem:[#allocation3 + $0xf8] sm:$0xff]   ;;  %v57_v33 = vpack.c.bf16 %v50_v32, %v50_v32  ;;  %v1151_v37 = vld [vmem:[#allocation3 + $0x140] sm:$0xff]  }
  0x20   :  { %989 = vmatprep.subr.bf16.mxu0 %v1131_v13  ;;  %v1146_v28 = vld [vmem:[#allocation3 + $0xb0] sm:$0xff]   ;;  %v1150_v34 = vld [vmem:[#allocation3 + $0xb8] sm:$0xff]   ;;  %v1152_v40 = vld [vmem:[#allocation3 + $0x100] sm:$0xff]  }
  0x21   :  { %1010 = vmatpush3.bf16.msra.mxu1 %v1130_v12  ;;  %v49_v35 = vld [vmem:[%s1378_s0] sm:$0xff]  ;;  %v52_v38 = vld [vmem:[%s1378_s0 + $0x18] sm:$0xff]  ;;  %498 = vmatprep.mubr.bf16.mxu0 %v57_v33  ;;  %v51_v41 = vld [vmem:[%s1378_s0 + $0x10] sm:$0xff] }
  0x22   :  { %1011 = vmatprep.subr.bf16.mxu1 %v1133_v15  ;;  %v56_v36 = vpack.c.bf16 %v49_v35, %v49_v35  ;;  %v59_v39 = vpack.c.bf16 %v52_v38, %v52_v38  ;;  %v58_v42 = vpack.c.bf16 %v51_v41, %v51_v41  ;;  %v1153_v43 = vld [vmem:[#allocation3 + $0x148] sm:$0xff]   ;;  %v1155_v46 = vld [vmem:[#allocation3 + $0x150] sm:$0xff]   ;;  %v1157_v48 = vld [vmem:[#allocation3 + $0x158] sm:$0xff]  }
  0x23   :  { %990 = vmatpush3.bf16.msra.mxu0 %v1132_v14  ;;  %v1154_v44 = vld [vmem:[#allocation3 + $0x108] sm:$0xff]   ;;  %v1156_v47 = vld [vmem:[#allocation3 + $0x110] sm:$0xff]   ;;  %v1158_v49 = vld [vmem:[#allocation3 + $0x118] sm:$0xff]  }
  0x24   :  { %991 = vmatprep.subr.bf16.mxu0 %v1135_v17  ;;  %538 = vmatprep.mubr.bf16.mxu1 %v59_v39  ;;  %v1159_v50 = vld [vmem:[#allocation3 + $0x160] sm:$0xff]   ;;  %v1161_v52 = vld [vmem:[#allocation3 + $0x168] sm:$0xff]   ;;  %v1163_v56 = vld [vmem:[#allocation3 + $0x170] sm:$0xff]  }
  0x25   :  { %1012 = vmatpush3.bf16.msra.mxu1 %v1134_v16  ;;  %v1160_v51 = vld [vmem:[#allocation3 + $0x120] sm:$0xff]   ;;  %v1162_v53 = vld [vmem:[#allocation3 + $0x128] sm:$0xff]   ;;  %v1164_v60 = vld [vmem:[#allocation3 + $0x130] sm:$0xff]  }
  0x26   :  { %1013 = vmatprep.subr.bf16.mxu1 %v1137_v19  ;;  %v1167_v54 = vld [vmem:[#allocation3 + $0x180] sm:$0xff]   ;;  %v55_v58 = vld [vmem:[%s1378_s0 + $0x30] sm:$0xff]  ;;  %v1165_v61 = vld [vmem:[#allocation3 + $0x178] sm:$0xff]  }
  0x27   :  { %992 = vmatpush3.bf16.msra.mxu0 %v1136_v18  ;;  %v54_v55 = vld [vmem:[%s1378_s0 + $0x28] sm:$0xff]  ;;  %v62_v59 = vpack.c.bf16 %v55_v58, %v55_v58  ;;  %v1166_v62 = vld [vmem:[#allocation3 + $0x138] sm:$0xff]   ;;  %v1170_v3 = vld [vmem:[%s1381_s3 + $0x10] sm:$0xff]  }
  0x28   :  { %993 = vmatprep.subr.bf16.mxu0 %v1139_v21  ;;  %v61_v57 = vpack.c.bf16 %v54_v55, %v54_v55  ;;  %v53_v63 = vld [vmem:[%s1378_s0 + $0x20] sm:$0xff]  ;;  %v1169_v2 = vld [vmem:[%s1381_s3 + $0x8] sm:$0xff]   ;;  %v1171_v4 = vld [vmem:[%s1381_s3 + $0x18] sm:$0xff]  }
  0x29   :  { %1014 = vmatpush3.bf16.msra.mxu1 %v1138_v20  ;;  %v60_v0 = vpack.c.bf16 %v53_v63, %v53_v63  ;;  %v1168_v1 = vld [vmem:[%s1381_s3] sm:$0xff]   ;;  %v1173_v6 = vld [vmem:[%s1381_s3 + $0x28] sm:$0xff]   ;;  %v1174_v7 = vld [vmem:[%s1381_s3 + $0x30] sm:$0xff]  }
  0x2a   :  { %1015 = vmatprep.subr.bf16.mxu1 %v1141_v23  ;;  %v1172_v5 = vld [vmem:[%s1381_s3 + $0x20] sm:$0xff]   ;;  %v1175_v8 = vld [vmem:[%s1381_s3 + $0x38] sm:$0xff]   ;;  %v1177_v10 = vld [vmem:[%s1383_s5 + $0x8] sm:$0xff]  }
  0x2b   :  { %994 = vmatpush3.bf16.msra.mxu0 %v1140_v22  ;;  %v1176_v9 = vld [vmem:[%s1383_s5] sm:$0xff]   ;;  %v1178_v38 = vld [vmem:[%s1383_s5 + $0x10] sm:$0xff]   ;;  %v1179_v39 = vld [vmem:[%s1383_s5 + $0x18] sm:$0xff]  }
  0x2c   :  { %995 = vmatprep.subr.bf16.mxu0 %v1143_v25  ;;  %v912_v12 = vld [vmem:[%s1380_s2] ss:$0 sm:$0xff] }
  0x2d   :  { %1016 = vmatpush3.bf16.msra.mxu1 %v1142_v24 }
  0x2e   :  { %1017 = vmatprep.subr.bf16.mxu1 %v1145_v27 }
  0x2f   :  { %996 = vmatpush3.bf16.msra.mxu0 %v1144_v26 }
  0x30   :  { %997 = vmatprep.subr.bf16.mxu0 %v1147_v29 }
  0x31   :  { %1018 = vmatpush3.bf16.msra.mxu1 %v1146_v28 }
  0x32   :  { %1019 = vmatprep.subr.bf16.mxu1 %v1149_v31 }
  0x33   :  { %998 = vmatpush3.bf16.msra.mxu0 %v1148_v30 }
  0x34   :  { %1027 = vmatprep.subr.bf16.mxu0 %v1151_v37 }
  0x35   :  { %1020 = vmatpush3.bf16.msra.mxu1 %v1150_v34 }
  0x36   :  { %499 = vmatmul.mubr.bf16.vlgmr.msra.gmra.mrb[0].mxu0 %v56_v36  ;;  %1068 = vmatprep.subr.bf16.mxu1 %v1213_v45 }
  0x37   :  { %1028 = vmatpush3.bf16.msra.mxu0 %v1152_v40  ;;  %578 = vmatprep.mubr.bf16.mxu0 %v61_v57  ;;  %v963_v40 = vld [vmem:[%s1382_s4] ss:$0 sm:$0xff] }
  0x38   :  { %539 = vmatmul.mubr.bf16.vlgmr.msra.gmra.mrb[0].mxu1 %v58_v42  ;;  %1029 = vmatprep.subr.bf16.mxu0 %v1153_v43 }
  0x39   :  { %1070 = vmatprep.mubr.msk.bf16.mxu1 %vm1214_vm0, %v1213_v45  ;;  %1069 = vmatpush3.bf16.msra.mxu1 %v1167_v54 }
  0x3a   :  { %1074 = vmatprep.subr.bf16.mxu1 %v1213_v45 }
  0x3b   :  { %1030 = vmatpush3.bf16.msra.mxu0 %v1154_v44 }
  0x3c   :  { %1031 = vmatprep.subr.bf16.mxu0 %v1155_v46 }
  0x3f   :  { %1032 = vmatpush3.bf16.msra.mxu0 %v1156_v47 }
  0x40   :  { %1033 = vmatprep.subr.bf16.mxu0 %v1157_v48  ;;  %1071 = vmatmul.mubr.msk.bf16.vlgmr.msra.gmra.mrb[4].mxu1 %vm462_vm1, %v62_v59 }
  0x41   :  { %1090 = vmatprep.mubr.msk.bf16.mxu1 %vm1214_vm0, %v1213_v45  ;;  %1075 = vmatpush3.bf16.msra.mxu1 %v1168_v1 }
  0x42   :  { %1076 = vmatprep.subr.bf16.mxu1 %v1213_v45 }
  0x43   :  { %1034 = vmatpush3.bf16.msra.mxu0 %v1158_v49 }
  0x44   :  { %1035 = vmatprep.subr.bf16.mxu0 %v1159_v50  ;;  %v1180_v50 = vld [vmem:[%s1385_s7] sm:$0xff]  }
  0x45   :  { %1077 = vmatpush3.bf16.msra.mxu1 %v1169_v2 }
  0x46   :  { %1078 = vmatprep.subr.bf16.mxu1 %v1213_v45 }
  0x47   :  { %1036 = vmatpush3.bf16.msra.mxu0 %v1160_v51  ;;  %v1181_v51 = vld [vmem:[%s1385_s7 + $0x8] sm:$0xff]  }
  0x48   :  { %1037 = vmatprep.subr.bf16.mxu0 %v1161_v52  ;;  %v972_v52 = vld [vmem:[%s1384_s6] ss:$0 sm:$0xff] }
  0x49   :  { %1079 = vmatpush3.bf16.msra.mxu1 %v1170_v3 }
  0x4a   :  { %1080 = vmatprep.subr.bf16.mxu1 %v1213_v45 }
  0x4b   :  { %1038 = vmatpush3.bf16.msra.mxu0 %v1162_v53 }
  0x4c   :  { %1039 = vmatprep.subr.bf16.mxu0 %v1163_v56 }
  0x4d   :  { %1081 = vmatpush3.bf16.msra.mxu1 %v1171_v4 }
  0x4e   :  { %1082 = vmatprep.subr.bf16.mxu1 %v1213_v45 }
  0x4f   :  { %1040 = vmatpush3.bf16.msra.mxu0 %v1164_v60 }
  0x50   :  { %1041 = vmatprep.subr.bf16.mxu0 %v1165_v61 }
  0x51   :  { %1083 = vmatpush3.bf16.msra.mxu1 %v1172_v5 }
  0x52   :  { %1084 = vmatprep.subr.bf16.mxu1 %v1213_v45 }
  0x53   :  { %1042 = vmatpush3.bf16.msra.mxu0 %v1166_v62 }
  0x54   :  { %1094 = vmatprep.subr.bf16.mxu0 %v1213_v45 }
  0x55   :  { %1085 = vmatpush3.bf16.msra.mxu1 %v1173_v6 }
  0x56   :  { %579 = vmatmul.mubr.bf16.vlgmr.msra.gmra.mrb[4].mxu0 %v60_v0  ;;  %1086 = vmatprep.subr.bf16.mxu1 %v1213_v45 }
  0x57   :  { %1102 = vmatprep.mubr.msk.bf16.mxu0 %vm1214_vm0, %v1213_v45  ;;  %1095 = vmatpush3.bf16.msra.mxu0 %v1176_v9 }
  0x58   :  { %1096 = vmatprep.subr.bf16.mxu0 %v1213_v45 }
  0x59   :  { %1087 = vmatpush3.bf16.msra.mxu1 %v1174_v7 }
  0x5a   :  { %1088 = vmatprep.subr.bf16.mxu1 %v1213_v45 }
  0x5b   :  { %1097 = vmatpush3.bf16.msra.mxu0 %v1177_v10 }
  0x5c   :  { %1098 = vmatprep.subr.bf16.mxu0 %v1213_v45 }
  0x5d   :  { %1089 = vmatpush3.bf16.msra.mxu1 %v1175_v8 }
  0x5e   :  { %1106 = vmatprep.subr.bf16.mxu1 %v1213_v45 }
  0x5f   :  { %1099 = vmatpush3.bf16.msra.mxu0 %v1178_v38 }
  0x60   :  { %1100 = vmatprep.subr.bf16.mxu0 %v1213_v45 }
  0x63   :  { %1101 = vmatpush3.bf16.msra.mxu0 %v1179_v39 }
 0x109   :  { %v999_v11 = vpop.f32.mrb[0].mxu0 }
 0x10a   :  { %v1000_v13 = vpop.f32.mrb[1].mxu0 }
 0x10b   :  { %v1001_v14 = vadd.f32 %v1000_v13, %v999_v11  ;;  %v1002_v15 = vpop.f32.mrb[2].mxu0  ;;  %v1021_v16 = vpop.f32.mrb[0].mxu1 }
 0x10c   :  { %v1003_v17 = vpop.f32.mrb[3].mxu0  ;;  %v1022_v19 = vpop.f32.mrb[1].mxu1 }
 0x10d   :  { %v501_v18 = vadd.f32 %v1001_v14, %v912_v12  ;;  %v1023_v20 = vadd.f32 %v1022_v19, %v1021_v16  ;;  %v1024_v21 = vpop.f32.mrb[2].mxu1 }
 0x10e   :  { %v1025_v22 = vpop.f32.mrb[3].mxu1 }
 0x10f   :  { %v541_v23 = vadd.f32 %v1023_v20, %v501_v18 }
 0x113   :  { %v620_v24 = vpop.f32.mrb[4].mxu1 }
 0x114   :  { %v1072_v25 = vpop.f32.mrb[5].mxu1 }
 0x115   :  { %v623_v26 = vpop.f32.mrb[6].mxu1 }
 0x116   :  { %v1073_v27 = vpop.f32.mrb[7].mxu1 }
 0x129   :  { %v1043_v28 = vpop.f32.mrb[4].mxu0 }
 0x12a   :  { %v1044_v29 = vpop.f32.mrb[5].mxu0 }
 0x12b   :  { %v1045_v30 = vadd.f32 %v1044_v29, %v1043_v28  ;;  %v1046_v31 = vpop.f32.mrb[6].mxu0 }
 0x12c   :  { %v1047_v32 = vpop.f32.mrb[7].mxu0 }
 0x12d   :  { %v581_v33 = vadd.f32 %v1045_v30, %v541_v23 }
 0x12f   :  { %v621_v34 = vadd.f32 %v620_v24, %v581_v33 }
 0x131   :  { %vm626_vm2 = vcmp.gt.f32.partialorder %v621_v34, 0.0  ;;  %v627_v35 = vmul.f32 0.1, %v621_v34 }
 0x133   :  { %v628_v36 = vsel %vm626_vm2, %v621_v34, %v627_v35 }
 0x134   :  { %v629_v37 = vpack.c.bf16 %v628_v36, %v628_v36 }
 0x136   :  { %1091 = vmatmul.mubr.bf16.vlgmr.msra.gmra.mrb[8].mxu1 %v629_v37 }
 0x137   :  { %1110 = vmatprep.mubr.msk.bf16.mxu1 %vm1214_vm0, %v1213_v45  ;;  %1107 = vmatpush3.bf16.msra.mxu1 %v1180_v50 }
 0x138   :  { %1108 = vmatprep.subr.bf16.mxu1 %v1213_v45  ;;  %v978_v45 = vld [vmem:[#allocation2] ss:$0 sm:$0xff] }
 0x13b   :  { %1109 = vmatpush3.bf16.msra.mxu1 %v1181_v51 }
 0x209   :  { %v735_v41 = vpop.f32.mrb[8].mxu1 }
 0x20a   :  { %v736_v42 = vadd.f32 %v963_v40, %v735_v41  ;;  %v1092_v43 = vpop.f32.mrb[9].mxu1 }
 0x20b   :  { %v738_v44 = vpop.f32.mrb[10].mxu1 }
 0x20c   :  { %vm741_vm3 = vcmp.gt.f32.partialorder %v736_v42, 0.0  ;;  %v742_v46 = vmul.f32 0.1, %v736_v42  ;;  %v1093_v47 = vpop.f32.mrb[11].mxu1 }
 0x20e   :  { %v743_v48 = vsel %vm741_vm3, %v736_v42, %v742_v46 }
 0x20f   :  { %v744_v49 = vpack.c.bf16 %v743_v48, %v743_v48 }
 0x211   :  { %1103 = vmatmul.mubr.msk.bf16.vlgmr.msra.gmra.mrb[8].mxu0 %vm784_vm4, %v744_v49 }
 0x2e4   :  { %v822_v53 = vpop.f32.mrb[8].mxu0 }
 0x2e5   :  { %v823_v54 = vadd.f32 %v972_v52, %v822_v53  ;;  %v1104_v55 = vpop.f32.mrb[9].mxu0 }
 0x2e6   :  { %v825_v56 = vpop.f32.mrb[10].mxu0 }
 0x2e7   :  { %vm828_vm5 = vcmp.gt.f32.partialorder %v823_v54, 0.0  ;;  %v829_v57 = vmul.f32 0.1, %v823_v54  ;;  %v1105_v58 = vpop.f32.mrb[11].mxu0 }
 0x2e9   :  { %v830_v59 = vsel %vm828_vm5, %v823_v54, %v829_v57 }
 0x2ea   :  { %v831_v60 = vpack.c.bf16 %v830_v59, %v830_v59 }
 0x2ec   :  { %1111 = vmatmul.mubr.msk.bf16.vlgmr.msra.gmra.mrb[12].mxu1 %vm855_vm6, %v831_v60 }
 0x3bf   :  { %v893_v61 = vpop.f32.mrb[12].mxu1 }
 0x3c0   :  { %v894_v62 = vadd.f32 %v978_v45, %v893_v61  ;;  %v1112_v63 = vpop.f32.mrb[13].mxu1 }
 0x3c1   :  { %v896_v0 = vpop.f32.mrb[14].mxu1 }
 0x3c2   :  { %v982_v1 = vmul.f32 -1.442695, %v894_v62  ;;  %v1113_v2 = vpop.f32.mrb[15].mxu1 }
 0x3c4   :  { %1182 = vpow2.f32 %v982_v1 }
 0x3ce   :  { %v1183_v3 = vpop.eup %1182 }
 0x3cf   :  { %v902_v4 = vadd.f32 1.0, %v1183_v3 }
 0x3d1   :  { %1184 = vrcp.f32 %v902_v4 }
 0x3db   :  { %v1185_v5 = vpop.eup %1184 }
 0x3dc   :  { %906 = vst.msk [vmem:[%s1387_s9] sm:$0xff] %vm905_vm7, %v1185_v5 }
 0x3dd   :  { %911 = vsyncpa [#allocation4], 1 }

</bundles_post_ra>
